<compile_context>
chip_gen: v6e
topology: v6e:2x2x1
jax: 0.10.0
libtpu: 0.0.40
codegen_flags: <defaults>
</compile_context>

<pallas_src>
import math

import jax
import jax.numpy as jnp
from jax.experimental import pallas as pl
from jax.experimental.pallas import tpu as pltpu

HIDDEN = 128    # fc1/fc2 width, fixed by the module definition
LANE = 128      # TPU lane width — fc3 output is padded to this (lane-dense vst)
MAX_TB = 2048   # batch tile cap; amortizes ~0.35 us per-grid-step overhead


def _round_up(n, m):
    return ((n + m - 1) // m) * m


def _dqn_kernel(x_ref, w1_ref, b1_ref, w2_ref, b2_ref, w3_ref, b3_ref, o_ref):
    # x arrives f32 (unpadded features); cast to bf16 for the MXU in-kernel.
    x = x_ref[...].astype(jnp.bfloat16)
    # fc1 + ReLU   (bf16 operands, f32 accumulation on the MXU)
    h1 = jnp.dot(x, w1_ref[...], preferred_element_type=jnp.float32)
    h1 = jnp.maximum(h1 + b1_ref[...], 0.0).astype(jnp.bfloat16)
    # fc2 + ReLU
    h2 = jnp.dot(h1, w2_ref[...], preferred_element_type=jnp.float32)
    h2 = jnp.maximum(h2 + b2_ref[...], 0.0).astype(jnp.bfloat16)
    # fc3 (output lane-padded to 128 columns; padding columns are exact zeros)
    out = jnp.dot(h2, w3_ref[...], preferred_element_type=jnp.float32)
    # bf16 store halves output HBM traffic; accumulation/bias stayed f32.
    o_ref[...] = (out + b3_ref[...]).astype(o_ref.dtype)


def init_dqn_params(key, input_dim, output_dim):
    """Deterministic init mimicking nn.Linear's U(-1/sqrt(in), 1/sqrt(in))."""
    ks = jax.random.split(key, 6)

    def linear(kw, kb, fan_in, fan_out):
        bound = 1.0 / math.sqrt(fan_in)
        # store weight as (in, out) == W.T of the PyTorch (out, in) layout
        w = jax.random.uniform(kw, (fan_in, fan_out), jnp.float32, -bound, bound)
        b = jax.random.uniform(kb, (1, fan_out), jnp.float32, -bound, bound)
        return w, b

    w1, b1 = linear(ks[0], ks[1], input_dim, HIDDEN)
    w2, b2 = linear(ks[2], ks[3], HIDDEN, HIDDEN)
    w3, b3 = linear(ks[4], ks[5], HIDDEN, output_dim)
    return {"w1": w1, "b1": b1, "w2": w2, "b2": b2, "w3": w3, "b3": b3}


def prepare_dqn_params(params):
    """Pad the fc3 output dim to 128 lanes and cast weights to bf16.

    w1 is kept UNPADDED at (in_dim, HIDDEN): the kernel contracts over the
    real in_dim directly, so x never needs a lane-padded copy.  Zero padding
    in w3/b3 columns contributes exactly 0 to the (sliced-off) extra outputs.
    """
    in_dim = params["w1"].shape[0]
    out_dim = params["w3"].shape[1]
    out_pad = _round_up(out_dim, LANE)

    w3 = jnp.zeros((HIDDEN, out_pad), jnp.float32).at[:, :out_dim].set(params["w3"])
    b3 = jnp.zeros((1, out_pad), jnp.float32).at[:, :out_dim].set(params["b3"])

    return {
        "w1": params["w1"].astype(jnp.bfloat16),   # (in_dim, 128), unpadded
        "b1": params["b1"].astype(jnp.float32),
        "w2": params["w2"].astype(jnp.bfloat16),
        "b2": params["b2"].astype(jnp.float32),
        "w3": w3.astype(jnp.bfloat16),
        "b3": b3,
        "in_dim": in_dim,
        "out_dim": out_dim,
    }


def dqn_forward(x, p):
    """Fused DQN MLP forward pass as a single batch-tiled Pallas kernel.

    x: (B, input_dim) float32
    p: output of prepare_dqn_params()
    returns: (B, output_dim) float32
    """
    B, in_dim = x.shape
    assert in_dim == p["in_dim"]
    out_pad = p["w3"].shape[1]
    out_dim = p["out_dim"]

    # Batch tile: multiple of 16 (bf16 sublane pack), capped at MAX_TB, and
    # chosen so large batches yield >= 2 grid iterations (keeps both v7x
    # TensorCores busy via the "parallel" batch axis).  Per-tile working set
    # at tb=2048 is < ~4 MiB double-buffered — far below the scoped-VMEM
    # default on v5e (16 MiB) / v6e / v7x (32 MiB).
    tb = min(MAX_TB, _round_up(pl.cdiv(B, 2), 16))
    b_pad = _round_up(B, tb)

    # Pad batch rows only when strictly needed (no lane padding of features).
    x_in = x if b_pad == B else jnp.pad(x, ((0, b_pad - B), (0, 0)))

    grid = (b_pad // tb,)

    # Full-array spec with a constant index map: weight/bias stays resident in
    # VMEM across all batch tiles (Pallas skips re-DMA when the block index
    # does not change).
    # TODO(synk): could add pipeline_mode=pl.Buffered(1) here to reclaim the
    # redundant second buffer for constants; skipped since VMEM is not tight.
    def const(a):
        return pl.BlockSpec(a.shape, lambda i: (0,) * a.ndim)

    flops = 2 * b_pad * (in_dim * HIDDEN + HIDDEN * HIDDEN + HIDDEN * out_pad)
    bytes_accessed = (
        b_pad * in_dim * 4                                        # x (f32)
        + (p["w1"].size + p["w2"].size + p["w3"].size) * 2        # weights bf16
        + (p["b1"].size + p["b2"].size + p["b3"].size) * 4        # biases f32
        + b_pad * out_pad * 2                                     # out bf16
    )

    out = pl.pallas_call(
        _dqn_kernel,
        out_shape=jax.ShapeDtypeStruct((b_pad, out_pad), jnp.bfloat16),
        grid=grid,
        in_specs=[
            # x: tiled over batch, feature dim unpadded (== full array dim).
            pl.BlockSpec((tb, in_dim), lambda i: (i, 0)),
            const(p["w1"]), const(p["b1"]),
            const(p["w2"]), const(p["b2"]),
            const(p["w3"]), const(p["b3"]),
        ],
        out_specs=pl.BlockSpec((tb, out_pad), lambda i: (i, 0)),
        compiler_params=pltpu.CompilerParams(
            dimension_semantics=("parallel",),  # shard batch tiles across TCs
        ),
        cost_estimate=pl.CostEstimate(
            flops=flops, transcendentals=0, bytes_accessed=bytes_accessed),
    )(x_in, p["w1"], p["b1"], p["w2"], p["b2"], p["w3"], p["b3"])

    # Slice real rows/columns and restore the module's f32 output dtype.
    return out[:B, :out_dim].astype(jnp.float32)


def dqn_forward_ref(x, params):
    """Pure-JAX reference mirroring the kernel's bf16-operand / f32-acc math."""
    xb = x.astype(jnp.bfloat16)
    w1 = params["w1"].astype(jnp.bfloat16)
    w2 = params["w2"].astype(jnp.bfloat16)
    w3 = params["w3"].astype(jnp.bfloat16)
    h1 = jnp.maximum(
        jnp.dot(xb, w1, preferred_element_type=jnp.float32) + params["b1"], 0.0)
    h2 = jnp.maximum(
        jnp.dot(h1.astype(jnp.bfloat16), w2, preferred_element_type=jnp.float32)
        + params["b2"], 0.0)
    return (jnp.dot(h2.astype(jnp.bfloat16), w3, preferred_element_type=jnp.float32)
            + params["b3"])


# NOTE: remember / select_action / replay are replay-buffer & training-loop
# host-side logic (RNG, deque, Adam step) — not kernel work.
# TODO(synk): Adam update / MSE backward (replay()) intentionally not
# implemented as a kernel; only the forward pass is the hot path here.

if __name__ == "__main__":
    input_dim, output_dim, batch = 16, 4, 8

    key = jax.random.PRNGKey(0)
    k_params, k_x = jax.random.split(key)
    params = init_dqn_params(k_params, input_dim, output_dim)
    prepared = prepare_dqn_params(params)
    x = jax.random.normal(k_x, (batch, input_dim), jnp.float32)

    y = dqn_forward(x, prepared)
    y = jax.block_until_ready(y)

    y_ref = dqn_forward_ref(x, params)
    assert y.shape == (batch, output_dim)
    assert jnp.allclose(y, y_ref, atol=1e-2, rtol=1e-2), "mismatch vs JAX reference"

    print("KERNEL_OK")
</pallas_src>

<mosaic_0001>
module attributes {stable_mosaic.version = 11 : i64} {
  func.func @_dqn_kernel(%arg0: i32, %arg1: memref<16x16xf32, #tpu.memory_space<vmem>>, %arg2: memref<16x128xbf16, #tpu.memory_space<vmem>>, %arg3: memref<1x128xf32, #tpu.memory_space<vmem>>, %arg4: memref<128x128xbf16, #tpu.memory_space<vmem>>, %arg5: memref<1x128xf32, #tpu.memory_space<vmem>>, %arg6: memref<128x128xbf16, #tpu.memory_space<vmem>>, %arg7: memref<1x128xf32, #tpu.memory_space<vmem>>, %arg8: memref<16x128xbf16, #tpu.memory_space<vmem>>) attributes {dimension_semantics = [#tpu.dimension_semantics<parallel>], iteration_bounds = array<i64: 1>, scalar_prefetch = 0 : i64, scratch_operands = 0 : i64, tpu.core_type = #tpu.core_type<tc>, window_params = [{transform_indices = @transform_0, window_bounds = array<i64: 16, 16>}, {pipeline_mode = #tpu.pipeline_mode<synchronous>, transform_indices = @transform_1, window_bounds = array<i64: 16, 128>}, {pipeline_mode = #tpu.pipeline_mode<synchronous>, transform_indices = @transform_2, window_bounds = array<i64: 1, 128>}, {pipeline_mode = #tpu.pipeline_mode<synchronous>, transform_indices = @transform_3, window_bounds = array<i64: 128, 128>}, {pipeline_mode = #tpu.pipeline_mode<synchronous>, transform_indices = @transform_4, window_bounds = array<i64: 1, 128>}, {pipeline_mode = #tpu.pipeline_mode<synchronous>, transform_indices = @transform_5, window_bounds = array<i64: 128, 128>}, {pipeline_mode = #tpu.pipeline_mode<synchronous>, transform_indices = @transform_6, window_bounds = array<i64: 1, 128>}, {transform_indices = @transform_7, window_bounds = array<i64: 16, 128>}]} {
    %c0 = arith.constant 0 : index
    %c0_0 = arith.constant 0 : index
    %0 = vector.load %arg1[%c0, %c0_0] : memref<16x16xf32, #tpu.memory_space<vmem>>, vector<16x16xf32>
    %1 = arith.truncf %0 : vector<16x16xf32> to vector<16x16xbf16>
    %c0_1 = arith.constant 0 : index
    %c0_2 = arith.constant 0 : index
    %2 = vector.load %arg2[%c0_1, %c0_2] : memref<16x128xbf16, #tpu.memory_space<vmem>>, vector<16x128xbf16>
    %cst = arith.constant dense<0.000000e+00> : vector<16x128xf32>
    %3 = tpu.matmul %1, %2, %cst {dimension_numbers = #tpu.dot_dimension_numbers<[1], [0], [0], [1], [0, 0, 1, 1], [], []>} : vector<16x16xbf16>, vector<16x128xbf16>, vector<16x128xf32> -> vector<16x128xf32>
    %c0_3 = arith.constant 0 : index
    %c0_4 = arith.constant 0 : index
    %4 = vector.load %arg3[%c0_3, %c0_4] : memref<1x128xf32, #tpu.memory_space<vmem>>, vector<1x128xf32>
    %5 = vector.broadcast %4 : vector<1x128xf32> to vector<16x128xf32>
    %6 = arith.addf %3, %5 : vector<16x128xf32>
    %cst_5 = arith.constant 0.000000e+00 : f32
    %7 = vector.broadcast %cst_5 : f32 to vector<16x128xf32>
    %8 = arith.maximumf %6, %7 : vector<16x128xf32>
    %9 = arith.truncf %8 : vector<16x128xf32> to vector<16x128xbf16>
    %c0_6 = arith.constant 0 : index
    %c0_7 = arith.constant 0 : index
    %10 = vector.load %arg4[%c0_6, %c0_7] : memref<128x128xbf16, #tpu.memory_space<vmem>>, vector<128x128xbf16>
    %cst_8 = arith.constant dense<0.000000e+00> : vector<16x128xf32>
    %11 = tpu.matmul %9, %10, %cst_8 {dimension_numbers = #tpu.dot_dimension_numbers<[1], [0], [0], [1], [0, 0, 1, 1], [], []>} : vector<16x128xbf16>, vector<128x128xbf16>, vector<16x128xf32> -> vector<16x128xf32>
    %c0_9 = arith.constant 0 : index
    %c0_10 = arith.constant 0 : index
    %12 = vector.load %arg5[%c0_9, %c0_10] : memref<1x128xf32, #tpu.memory_space<vmem>>, vector<1x128xf32>
    %13 = vector.broadcast %12 : vector<1x128xf32> to vector<16x128xf32>
    %14 = arith.addf %11, %13 : vector<16x128xf32>
    %cst_11 = arith.constant 0.000000e+00 : f32
    %15 = vector.broadcast %cst_11 : f32 to vector<16x128xf32>
    %16 = arith.maximumf %14, %15 : vector<16x128xf32>
    %17 = arith.truncf %16 : vector<16x128xf32> to vector<16x128xbf16>
    %c0_12 = arith.constant 0 : index
    %c0_13 = arith.constant 0 : index
    %18 = vector.load %arg6[%c0_12, %c0_13] : memref<128x128xbf16, #tpu.memory_space<vmem>>, vector<128x128xbf16>
    %cst_14 = arith.constant dense<0.000000e+00> : vector<16x128xf32>
    %19 = tpu.matmul %17, %18, %cst_14 {dimension_numbers = #tpu.dot_dimension_numbers<[1], [0], [0], [1], [0, 0, 1, 1], [], []>} : vector<16x128xbf16>, vector<128x128xbf16>, vector<16x128xf32> -> vector<16x128xf32>
    %c0_15 = arith.constant 0 : index
    %c0_16 = arith.constant 0 : index
    %20 = vector.load %arg7[%c0_15, %c0_16] : memref<1x128xf32, #tpu.memory_space<vmem>>, vector<1x128xf32>
    %21 = vector.broadcast %20 : vector<1x128xf32> to vector<16x128xf32>
    %22 = arith.addf %19, %21 : vector<16x128xf32>
    %23 = arith.truncf %22 : vector<16x128xf32> to vector<16x128xbf16>
    %c0_17 = arith.constant 0 : index
    %c0_18 = arith.constant 0 : index
    %24 = vector.load %arg8[%c0_17, %c0_18] : memref<16x128xbf16, #tpu.memory_space<vmem>>, vector<16x128xbf16>
    tpu.vector_store %arg8[%c0_17, %c0_18], %23 {strides = array<i32>} : memref<16x128xbf16, #tpu.memory_space<vmem>>, vector<16x128xbf16>,
    return
  }
  func.func @transform_0(%arg0: i32) -> (i32, i32) {
    %c0_i32 = arith.constant 0 : i32
    %c0_i32_0 = arith.constant 0 : i32
    return %arg0, %c0_i32 : i32, i32
  }
  func.func @transform_1(%arg0: i32) -> (i32, i32) {
    %c0_i32 = arith.constant 0 : i32
    %c0_i32_0 = arith.constant 0 : i32
    %c0_i32_1 = arith.constant 0 : i32
    return %c0_i32, %c0_i32_0 : i32, i32
  }
  func.func @transform_2(%arg0: i32) -> (i32, i32) {
    %c0_i32 = arith.constant 0 : i32
    %c0_i32_0 = arith.constant 0 : i32
    %c0_i32_1 = arith.constant 0 : i32
    return %c0_i32, %c0_i32_0 : i32, i32
  }
  func.func @transform_3(%arg0: i32) -> (i32, i32) {
    %c0_i32 = arith.constant 0 : i32
    %c0_i32_0 = arith.constant 0 : i32
    %c0_i32_1 = arith.constant 0 : i32
    return %c0_i32, %c0_i32_0 : i32, i32
  }
  func.func @transform_4(%arg0: i32) -> (i32, i32) {
    %c0_i32 = arith.constant 0 : i32
    %c0_i32_0 = arith.constant 0 : i32
    %c0_i32_1 = arith.constant 0 : i32
    return %c0_i32, %c0_i32_0 : i32, i32
  }
  func.func @transform_5(%arg0: i32) -> (i32, i32) {
    %c0_i32 = arith.constant 0 : i32
    %c0_i32_0 = arith.constant 0 : i32
    %c0_i32_1 = arith.constant 0 : i32
    return %c0_i32, %c0_i32_0 : i32, i32
  }
  func.func @transform_6(%arg0: i32) -> (i32, i32) {
    %c0_i32 = arith.constant 0 : i32
    %c0_i32_0 = arith.constant 0 : i32
    %c0_i32_1 = arith.constant 0 : i32
    return %c0_i32, %c0_i32_0 : i32, i32
  }
  func.func @transform_7(%arg0: i32) -> (i32, i32) {
    %c0_i32 = arith.constant 0 : i32
    %c0_i32_0 = arith.constant 0 : i32
    return %arg0, %c0_i32 : i32, i32
  }
}

</mosaic_0001>

<bundles_post_ra>
// kernel: tpu_custom_call.1
= control target key start
LH: loop header
LB: loop body
LE: loop exit
PB: predicated region body
PF: predicated region fallthrough
CT: control target
= control target key end

     0   :  { %12 = vsyncpa [#allocation3], 0  ;;  %s747_s0 = inlined_call_operand.hbm [shape: f32[16,16], index: 0, kind: input, shape index: {}]   ;;  %s748_s1 = inlined_call_operand.hbm [shape: bf16[16,128], index: 1, kind: input, shape index: {}]   ;;  %s749_s2 = inlined_call_operand.vmem [shape: f32[1,128], index: 2, kind: input, shape index: {}]   ;;  %s750_s3 = inlined_call_operand.hbm [shape: bf16[128,128], index: 3, kind: input, shape index: {}]   ;;  %s751_s4 = inlined_call_operand.vmem [shape: f32[1,128], index: 4, kind: input, shape index: {}]   ;;  %s752_s5 = inlined_call_operand.hbm [shape: bf16[128,128], index: 5, kind: input, shape index: {}]   ;;  %s753_s6 = inlined_call_operand.vmem [shape: f32[1,128], index: 6, kind: input, shape index: {}]   ;;  %s754_s7 = inlined_call_operand.hbm [shape: bf16[16,128], index: 7, kind: output, shape index: {}]  }
   0x1   :  { %13 = vsyncpa [#allocation6], 0 }
   0x2   :  { %14 = vsyncpa [#allocation9], 0 }
   0x3   :  { %15 = vsyncpa [#allocation4], 0  ;;  %s637_s24 = smov [#allocation5]  }
   0x4   :  { %s33_s25 = sshll.u32 %s637_s24, 4  ;;  %s34_s25 = int_to_ptr.vmem [resolvable:$true] %s33_s25 }
   0x5   :  { %s537_s26 = scalar_lea.vmem %s34_s25, 128  ;;  %p542_p1 = scmp.lt.s32.totalorder %s34_s25, %s34_s25 }
   0x6   :  { %p538_p0 = scmp.ne.s32.totalorder %s34_s25, %s537_s26  ;;  %p543_p2 = scmp.lt.s32.totalorder %s537_s26, %s537_s26 }
   0x8   :  { %p544_p3 = por %p543_p2, %p542_p1 }
   0xa   :  { %p545_p4 = pnand %p544_p3, %p538_p0 }
   0xc   :  { %548 = shalt.err (!%p545_p4)
}
   0xd   :  { %s638_s27 = smov 64   ;;  %s639_s28 = smov 4  }
   0xe   :  { %39 = dma.hbm_to_vmem [thread:$0]  %s748_s1, 128, %s34_s25, [#allocation6], %s638_s27, %s638_s27, %s639_s28  }
   0xf   :  { %s640_s8 = smov [#allocation2]  }
  0x10   :  { %s21_s9 = sshll.u32 %s640_s8, 4  ;;  %s22_s9 = int_to_ptr.vmem [resolvable:$true] %s21_s9 }
  0x11   :  { %s557_s10 = scalar_lea.vmem %s22_s9, 256  ;;  %p562_p6 = scmp.lt.s32.totalorder %s22_s9, %s22_s9 }
  0x12   :  { %p558_p5 = scmp.ne.s32.totalorder %s22_s9, %s557_s10  ;;  %p563_p7 = scmp.lt.s32.totalorder %s557_s10, %s557_s10 }
  0x14   :  { %p564_p8 = por %p563_p7, %p562_p6 }
  0x16   :  { %p565_p9 = pnand %p564_p8, %p558_p5 }
  0x18   :  { %568 = shalt.err (!%p565_p9)
}
  0x19   :  { %s641_s11 = smov 128   ;;  %s642_s12 = smov 8  }
  0x1a   :  { %27 = dma.hbm_to_vmem [thread:$0]  %s747_s0, 256, %s22_s9, [#allocation3], %s641_s11, %s641_s11, %s642_s12  }
  0x1b   :  { %s643_s15 = smov [#allocation7]   ;;  %s644_s17 = smov [#allocation8]  }
  0x1c   :  { %s47_s16 = sshll.u32 %s643_s15, 4  ;;  %s61_s1 = sshll.u32 %s644_s17, 4  ;;  %s48_s16 = int_to_ptr.vmem [resolvable:$true] %s47_s16  ;;  %s62_s1 = int_to_ptr.vmem [resolvable:$true] %s61_s1 }
  0x1d   :  { %s577_s18 = scalar_lea.vmem %s48_s16, 1024  ;;  %p582_p11 = scmp.lt.s32.totalorder %s48_s16, %s48_s16 }
  0x1e   :  { %p578_p10 = scmp.ne.s32.totalorder %s48_s16, %s577_s18  ;;  %p583_p12 = scmp.lt.s32.totalorder %s577_s18, %s577_s18 }
  0x20   :  { %p584_p13 = por %p583_p12, %p582_p11 }
  0x22   :  { %p585_p0 = pnand %p584_p13, %p578_p10 }
  0x24   :  { %588 = shalt.err (!%p585_p0)
}
  0x25   :  { %53 = dma.hbm_to_vmem [thread:$0]  %s750_s3, 1024, %s48_s16, [#allocation6], %s638_s27, %s638_s27, %s639_s28  }
  0x26   :  { %s597_s0 = scalar_lea.vmem %s62_s1, 1024  ;;  %p602_p2 = scmp.lt.s32.totalorder %s62_s1, %s62_s1 }
  0x27   :  { %p598_p1 = scmp.ne.s32.totalorder %s62_s1, %s597_s0  ;;  %p603_p3 = scmp.lt.s32.totalorder %s597_s0, %s597_s0 }
  0x29   :  { %p604_p4 = por %p603_p3, %p602_p2 }
  0x2b   :  { %p605_p5 = pnand %p604_p4, %p598_p1 }
  0x2d   :  { %608 = shalt.err (!%p605_p5)
}
  0x2e   :  { %67 = dma.hbm_to_vmem [thread:$0]  %s752_s5, 1024, %s62_s1, [#allocation9], %s638_s27, %s638_s27, %s639_s28  }
  0x2f   :  { %629 = dma.done.wait [#allocation3], 256  }
  0x30   :  { %630 = vsyncadd [#allocation3], 4294967040 }
  0x31   :  { %631 = dma.done.wait [#allocation6], 1152  }
  0x32   :  { %632 = vsyncadd [#allocation6], 4294966144 }
  0x33   :  { %633 = dma.done.wait [#allocation9], 1024  }
  0x34   :  { %634 = vsyncadd [#allocation9], 4294966272  ;;  %v645_v0 = vmov 0.0   ;;  %vm646_vm0 = vmmov 0   ;;  %v512_v1 = vld [vmem:[#allocation5] sm:$0xff]   ;;  %v83_v2 = vld [vmem:[#allocation2] sm:$0xff] }
  0x35   :  { %455 = vmatprep.subr.bf16.mxu0 %v645_v0  ;;  %457 = vmatprep.mubr.msk.bf16.mxu0 %vm646_vm0, %v645_v0  ;;  %v84_v3 = vld [vmem:[#allocation2 + $0x8] sm:$0xff]  ;;  %vm101_vm1 = vcmask 130048   ;;  %v513_v5 = vld [vmem:[#allocation7 + $0x38] sm:$0xff]   ;;  %v515_v7 = vld [vmem:[#allocation7 + $0x28] sm:$0xff]   ;;  %s647_s26 = smov [#allocation10]  }
  0x36   :  { %461 = vmatprep.subr.bf16.mxu1 %v645_v0  ;;  %477 = vmatprep.mubr.msk.bf16.mxu1 %vm646_vm0, %v645_v0  ;;  %v85_v4 = vpack.c.bf16 %v84_v3, %v83_v2  ;;  %v514_v6 = vld [vmem:[#allocation7 + $0x30] sm:$0xff]   ;;  %v516_v8 = vld [vmem:[#allocation7 + $0x20] sm:$0xff]   ;;  %v517_v9 = vld [vmem:[#allocation7 + $0x18] sm:$0xff]   ;;  %s391_s29 = sshll.u32 %s647_s26, 4  ;;  %s392_s29 = int_to_ptr.vmem [resolvable:$true] %s391_s29 }
  0x37   :  { %456 = vmatpush3.bf16.msra.mxu0 %v512_v1  ;;  %462 = vmatpush3.bf16.msra.mxu1 %v513_v5  ;;  %v518_v10 = vld [vmem:[#allocation7 + $0x10] sm:$0xff]   ;;  %v519_v11 = vld [vmem:[#allocation7 + $0x8] sm:$0xff]   ;;  %v520_v12 = vld [vmem:[#allocation7] sm:$0xff]   ;;  %p614_p7 = scmp.lt.s32.totalorder %s392_s29, %s392_s29 }
  0x38   :  { %481 = vmatprep.subr.bf16.mxu0 %v645_v0  ;;  %463 = vmatprep.subr.bf16.mxu1 %v645_v0  ;;  %v521_v13 = vld [vmem:[#allocation8 + $0x38] sm:$0xff]   ;;  %v522_v14 = vld [vmem:[#allocation8 + $0x30] sm:$0xff]   ;;  %v523_v15 = vld [vmem:[#allocation8 + $0x28] sm:$0xff]  }
  0x39   :  { %v524_v16 = vld [vmem:[#allocation8 + $0x20] sm:$0xff]   ;;  %v525_v17 = vld [vmem:[#allocation8 + $0x18] sm:$0xff]   ;;  %v405_v18 = vld [vmem:[%s749_s2] ss:$0 sm:$0xff] }
  0x3a   :  { %458 = vmatmul.mubr.msk.bf16.vlgmr.msra.gmra.mxu0 %vm101_vm1, %v85_v4  ;;  %v526_v28 = vld [vmem:[#allocation8 + $0x10] sm:$0xff]   ;;  %v527_v29 = vld [vmem:[#allocation8 + $0x8] sm:$0xff]   ;;  %v528_v30 = vld [vmem:[#allocation8] sm:$0xff]  }
  0x3b   :  { %497 = vmatprep.mubr.msk.bf16.mxu0 %vm646_vm0, %v645_v0  ;;  %464 = vmatpush3.bf16.msra.mxu1 %v514_v6  ;;  %v408_v31 = vld [vmem:[%s751_s4] ss:$0 sm:$0xff]  ;;  %s609_s4 = scalar_lea.vmem %s392_s29, 128 }
  0x3c   :  { %465 = vmatprep.subr.bf16.mxu1 %v645_v0  ;;  %482 = vmatpush3.bf16.msra.mxu0 %v521_v13  ;;  %v417_v42 = vld [vmem:[%s753_s6] ss:$0 sm:$0xff]  ;;  %p610_p6 = scmp.ne.s32.totalorder %s392_s29, %s609_s4  ;;  %p615_p8 = scmp.lt.s32.totalorder %s609_s4, %s609_s4 }
  0x3d   :  { %483 = vmatprep.subr.bf16.mxu0 %v645_v0 }
  0x3e   :  { %p616_p9 = por %p615_p8, %p614_p7 }
  0x3f   :  { %466 = vmatpush3.bf16.msra.mxu1 %v515_v7 }
  0x40   :  { %467 = vmatprep.subr.bf16.mxu1 %v645_v0  ;;  %484 = vmatpush3.bf16.msra.mxu0 %v522_v14  ;;  %p617_p10 = pnand %p616_p9, %p610_p6 }
  0x41   :  { %485 = vmatprep.subr.bf16.mxu0 %v645_v0 }
  0x43   :  { %468 = vmatpush3.bf16.msra.mxu1 %v516_v8 }
  0x44   :  { %469 = vmatprep.subr.bf16.mxu1 %v645_v0  ;;  %486 = vmatpush3.bf16.msra.mxu0 %v523_v15 }
  0x45   :  { %487 = vmatprep.subr.bf16.mxu0 %v645_v0 }
  0x47   :  { %470 = vmatpush3.bf16.msra.mxu1 %v517_v9 }
  0x48   :  { %471 = vmatprep.subr.bf16.mxu1 %v645_v0  ;;  %488 = vmatpush3.bf16.msra.mxu0 %v524_v16 }
  0x49   :  { %489 = vmatprep.subr.bf16.mxu0 %v645_v0 }
  0x4b   :  { %472 = vmatpush3.bf16.msra.mxu1 %v518_v10 }
  0x4c   :  { %473 = vmatprep.subr.bf16.mxu1 %v645_v0  ;;  %490 = vmatpush3.bf16.msra.mxu0 %v525_v17 }
  0x4d   :  { %491 = vmatprep.subr.bf16.mxu0 %v645_v0 }
  0x4f   :  { %474 = vmatpush3.bf16.msra.mxu1 %v519_v11 }
  0x50   :  { %475 = vmatprep.subr.bf16.mxu1 %v645_v0  ;;  %492 = vmatpush3.bf16.msra.mxu0 %v526_v28 }
  0x51   :  { %493 = vmatprep.subr.bf16.mxu0 %v645_v0 }
  0x53   :  { %476 = vmatpush3.bf16.msra.mxu1 %v520_v12 }
  0x54   :  { %494 = vmatpush3.bf16.msra.mxu0 %v527_v29 }
  0x55   :  { %495 = vmatprep.subr.bf16.mxu0 %v645_v0 }
  0x58   :  { %496 = vmatpush3.bf16.msra.mxu0 %v528_v30 }
  0xfa   :  { %v139_v19 = vpop.f32.mrf.mxu0 }
  0xfb   :  { %v140_v21 = vadd.f32 %v405_v18, %v139_v19 }
  0xfc   :  { %v459_v20 = vpop.f32.mrf.mxu0 }
  0xfd   :  { %v146_v25 = vmax.f32 %v140_v21, 0.0 }
  0xfe   :  { %v142_v22 = vpop.f32.mrf.mxu0 }
  0xff   :  { %v143_v23 = vadd.f32 %v405_v18, %v142_v22 }
 0x100   :  { %v460_v24 = vpop.f32.mrf.mxu0 }
 0x101   :  { %v147_v26 = vmax.f32 %v143_v23, 0.0 }
 0x103   :  { %v148_v27 = vpack.c.bf16 %v147_v26, %v146_v25 }
 0x105   :  { %478 = vmatmul.mubr.bf16.vlgmr.msra.gmra.mxu1 %v148_v27 }
 0x1c5   :  { %v254_v32 = vpop.f32.mrf.mxu1 }
 0x1c6   :  { %v255_v34 = vadd.f32 %v408_v31, %v254_v32 }
 0x1c7   :  { %v479_v33 = vpop.f32.mrf.mxu1 }
 0x1c8   :  { %v261_v38 = vmax.f32 %v255_v34, 0.0 }
 0x1c9   :  { %v257_v35 = vpop.f32.mrf.mxu1 }
 0x1ca   :  { %v258_v36 = vadd.f32 %v408_v31, %v257_v35 }
 0x1cb   :  { %v480_v37 = vpop.f32.mrf.mxu1 }
 0x1cc   :  { %v262_v39 = vmax.f32 %v258_v36, 0.0 }
 0x1ce   :  { %v263_v40 = vpack.c.bf16 %v262_v39, %v261_v38 }
 0x1d0   :  { %498 = vmatmul.mubr.bf16.vlgmr.msra.gmra.mxu0 %v263_v40 }
 0x290   :  { %v369_v41 = vpop.f32.mrf.mxu0 }
 0x291   :  { %v370_v45 = vadd.f32 %v417_v42, %v369_v41 }
 0x292   :  { %v499_v43 = vpop.f32.mrf.mxu0 }
 0x294   :  { %v372_v44 = vpop.f32.mrf.mxu0 }
 0x295   :  { %v373_v46 = vadd.f32 %v417_v42, %v372_v44 }
 0x296   :  { %v500_v47 = vpop.f32.mrf.mxu0 }
 0x297   :  { %v433_v48 = vpack.c.bf16 %v373_v46, %v370_v45 }
 0x299   :  { %434 = vst [vmem:[#allocation10] sm:$0xff] %v433_v48  }
 0x29a   :  { %620 = shalt.err (!%p617_p10)
}
 0x29b   :  { %397 = dma.vmem_to_hbm [thread:$0]  %s392_s29, 128, %s754_s7, [#allocation4], %s638_s27, %s638_s27, %s639_s28  }
 0x29c   :  { %635 = dma.done.wait [#allocation4], 128  }
 0x29d   :  { %636 = vsyncadd [#allocation4], 4294967168 }
 0x29e   :  { %401 = vsyncpa [#allocation3], 1 }
 0x29f   :  { %402 = vsyncpa [#allocation6], 1 }
 0x2a0   :  { %403 = vsyncpa [#allocation9], 1 }
 0x2a1   :  { %404 = vsyncpa [#allocation4], 1 }

</bundles_post_ra>
